<compile_context>
chip_gen: v5e
topology: v5e:2x2
jax: 0.10.0
libtpu: 0.0.40
codegen_flags: <defaults>
</compile_context>

<pallas_src>
import functools
import math

import jax
import jax.numpy as jnp
from jax.experimental import pallas as pl
from jax.experimental.pallas import tpu as pltpu


# ---------------------------------------------------------------------------
# Generation-aware VMEM budgeting
# ---------------------------------------------------------------------------
def _vmem_budget_bytes():
    """Return (double_buffered_tile_budget, vmem_limit) from the chip's VMEM."""
    cap = 64 * 1024 * 1024
    try:
        cap = int(getattr(pltpu.get_tpu_info(), "vmem_capacity_bytes", cap))
    except Exception:  # unknown backend / interpret mode
        pass
    if cap >= 100 * 1024 * 1024:            # v5e / v6e: 128 MiB physical VMEM
        return 48 * 1024 * 1024, 96 * 1024 * 1024
    # v7x (64 MiB per TensorCore) or unknown: stay conservative.
    return 20 * 1024 * 1024, 40 * 1024 * 1024


# ---------------------------------------------------------------------------
# Kernel 1: flat, lane-dense weighted sum (hot path, matching channel counts)
# ---------------------------------------------------------------------------
def _flat_fusion_kernel(*refs, n_fuse, weighted, w_idx):
    w_ref = refs[0]                       # (n,) fusion weights in SMEM
    x_ref = refs[1]                       # (block_rows, lane) tile of x
    f_refs = refs[2:2 + n_fuse]           # per-feature tiles
    o_ref = refs[2 + n_fuse]

    acc = x_ref[...]
    acc_dtype = acc.dtype
    # Deliberate: accumulate in the input dtype (matches the PyTorch forward).
    if weighted:
        acc = acc * w_ref[0].astype(acc_dtype)
    for i in range(n_fuse):
        a = f_refs[i][...]
        if a.dtype != acc_dtype:          # static at trace time
            a = a.astype(acc_dtype)
        if weighted:
            a = a * w_ref[w_idx[i]].astype(acc_dtype)
        acc = acc + a
    o_ref[...] = acc.astype(o_ref.dtype)


def _choose_2d_view(shape):
    """Pick a (rows, lane) 2D view of the flat tensor.

    Prefers a lane that is a large multiple of 128 (unmasked, lane-dense
    stores) while leaving >= 16 rows so the grid can have >= 2 steps
    (megacore sharding on v7x).  Non-128-divisible tensors use the natural
    (N*C, H*W) split -- no pad/slice HBM pass; the partial lane is masked.
    """
    total = math.prod(shape)
    if total % 128 == 0:
        lane_cap = 4096
        kmax = max(1, min(lane_cap // 128, total // 128))
        best_lane = None
        for k in range(kmax, 0, -1):
            lane = 128 * k
            if total % lane != 0:
                continue
            if best_lane is None:
                best_lane = lane          # largest 128-multiple divisor
            if total // lane >= 16:
                return total // lane, lane
        return total // best_lane, best_lane
    if len(shape) >= 2:
        lane = shape[-1] * shape[-2]
        return total // lane, lane
    return 1, total


def _flat_fusion(x, feats_same, w, w_idx, weighted):
    orig_shape = x.shape
    itemsize = x.dtype.itemsize
    rows, lane = _choose_2d_view(x.shape)
    n_fuse = len(feats_same)
    n_streams = 2 + n_fuse                      # x + features + output
    budget, vmem_limit = _vmem_budget_bytes()

    if 2 * n_streams * 8 * lane * itemsize > vmem_limit:
        # TODO(synk): huge non-128-aligned spatial maps fall back to plain JAX.
        acc = x
        if weighted:
            acc = acc * w[0]
        for f, wi in zip(feats_same, w_idx):
            fa = f
            if weighted:
                fa = fa * w[wi]
            acc = acc + fa
        return acc.astype(x.dtype)

    x2 = x.reshape(rows, lane)
    f2 = [f.reshape(rows, lane) for f in feats_same]

    # Biggest 8-aligned row block whose double-buffered footprint across all
    # streams stays within the generation-aware budget.
    tile_cap_bytes = max(8 * lane * itemsize, budget // (2 * n_streams))
    block_rows = max(8, (tile_cap_bytes // (lane * itemsize)) // 8 * 8)
    if rows >= 16:
        # Guarantee >= 2 grid steps so "parallel" can shard across both
        # TensorCores on v7x (near-free on single-TC chips).
        half = -(-rows // 2)
        half = -(-half // 8) * 8
        block_rows = min(block_rows, half)
    block_rows = min(block_rows, rows)

    grid = (pl.cdiv(rows, block_rows),)
    slab_spec = pl.BlockSpec((block_rows, lane), lambda r: (r, 0))
    kernel = functools.partial(_flat_fusion_kernel, n_fuse=n_fuse,
                               weighted=weighted, w_idx=tuple(w_idx))

    out2 = pl.pallas_call(
        kernel,
        out_shape=jax.ShapeDtypeStruct((rows, lane), x.dtype),
        grid_spec=pl.GridSpec(
            grid=grid,
            in_specs=[pl.BlockSpec(memory_space=pltpu.MemorySpace.SMEM)]
                     + [slab_spec] * (1 + n_fuse),
            out_specs=slab_spec,
        ),
        compiler_params=pltpu.CompilerParams(
            dimension_semantics=("parallel",),
            vmem_limit_bytes=vmem_limit),
    )(w, x2, *f2)
    return out2.reshape(orig_shape)


# ---------------------------------------------------------------------------
# Kernel 2: fused channel-prefix add (cold path, every mismatched shortcut)
# ---------------------------------------------------------------------------
def _prefix_fusion_kernel(*refs, n_feat, weighted, w_idx, prefix_blocks,
                          c_grid):
    w_ref = refs[0]
    y_ref = refs[1]
    a_refs = refs[2:2 + n_feat]
    o_ref = refs[2 + n_feat]

    acc = y_ref[...]
    acc_dtype = acc.dtype
    c = pl.program_id(1)
    for j in range(n_feat):
        a = a_refs[j][...]
        if a.dtype != acc_dtype:
            a = a.astype(acc_dtype)
        if weighted:
            a = a * w_ref[w_idx[j]].astype(acc_dtype)
        if prefix_blocks[j] < c_grid:
            # Select (never multiply-by-mask) so Inf/NaN in the clamped dummy
            # block cannot produce NaN in channels that must stay untouched.
            a = jnp.where(c < prefix_blocks[j], a, jnp.zeros_like(a))
        acc = acc + a
    o_ref[...] = acc.astype(o_ref.dtype)


def _prefix_fusion(y, feats, w, w_idx, weighted, *, alias):
    """out = y;  out[:, :nc_j] += (w[idx_j] *) a_j[:, :nc_j], nc_j=min(Ca_j,Cy).

    All mismatched shortcuts are fused into a single pallas_call.  When
    `alias` is True (y is an intermediate this module owns), y's HBM buffer is
    aliased to the output and the grid only visits prefix channel blocks.
    """
    N, nx, H, W = y.shape
    hw = H * W
    ib = y.dtype.itemsize
    prefixes = [min(int(f.shape[1]), nx) for f in feats]

    # Channel block: 8-aligned and divides every prefix length so no block
    # mixes prefix and non-prefix channels of y.
    tc = 0
    for cand in (256, 128, 64, 32, 16, 8):
        if all(p % cand == 0 for p in prefixes):
            tc = cand
            break
    if tc == 0:
        # TODO(synk): prefixes that are not 8-aligned fall back to plain JAX.
        out = y
        for f, wi, nc in zip(feats, w_idx, prefixes):
            fa = f[:, :nc]
            if weighted:
                fa = fa * w[wi]
            out = out.at[:, :nc].add(fa.astype(y.dtype))
        return out

    prefix_blocks = [p // tc for p in prefixes]
    max_pb = max(prefix_blocks)
    n_out_cblocks = pl.cdiv(nx, tc)
    c_grid = max_pb if alias else n_out_cblocks

    budget, vmem_limit = _vmem_budget_bytes()
    n_streams = 2 + len(feats)
    max_hw_elems = max(128, budget // (2 * n_streams * tc * ib))
    if hw <= max_hw_elems:
        hw_blk = hw            # full row (allowed even when hw % 128 != 0)
    else:
        hw_blk = (max_hw_elems // 128) * 128   # lane-dense spatial tile
    h_grid = pl.cdiv(hw, hw_blk)

    y3 = y.reshape(N, nx, hw)
    a3 = [f.reshape(N, int(f.shape[1]), hw) for f in feats]

    def yo_map(n, c, h):
        return (n, c, h)

    def make_a_map(pj):
        if pj == c_grid:
            return lambda n, c, h: (n, c, h)
        last = pj - 1
        return lambda n, c, h: (n, jnp.minimum(c, last), h)

    yo_spec = pl.BlockSpec((1, tc, hw_blk), yo_map)
    a_specs = [pl.BlockSpec((1, tc, hw_blk), make_a_map(pj))
               for pj in prefix_blocks]

    kernel = functools.partial(
        _prefix_fusion_kernel, n_feat=len(feats), weighted=weighted,
        w_idx=tuple(w_idx), prefix_blocks=tuple(prefix_blocks), c_grid=c_grid)

    call_kwargs = {}
    if alias:
        # y (operand index 1, after w) shares its HBM buffer with the output,
        # so channel blocks outside the prefix grid keep their values with
        # zero HBM traffic.
        call_kwargs["input_output_aliases"] = {1: 0}

    out3 = pl.pallas_call(
        kernel,
        out_shape=jax.ShapeDtypeStruct((N, nx, hw), y.dtype),
        grid_spec=pl.GridSpec(
            grid=(N, c_grid, h_grid),
            in_specs=[pl.BlockSpec(memory_space=pltpu.MemorySpace.SMEM),
                      yo_spec] + a_specs,
            out_specs=yo_spec,
        ),
        compiler_params=pltpu.CompilerParams(
            dimension_semantics=("parallel", "parallel", "parallel"),
            vmem_limit_bytes=vmem_limit),
        **call_kwargs,
    )(w, y3, *a3)
    return out3.reshape(N, nx, H, W)


# ---------------------------------------------------------------------------
# Public wrapper mirroring WeightedFeatureFusion.forward(x, outputs)
# ---------------------------------------------------------------------------
def weighted_feature_fusion(x, outputs, layers, weight=False, w_param=None):
    n = len(layers) + 1
    if weight:
        if w_param is None:
            w_param = jnp.zeros((n,), jnp.float32)
        w = jax.nn.sigmoid(w_param.astype(jnp.float32)) * (2.0 / n)
    else:
        w = jnp.ones((n,), jnp.float32)         # never read by the kernels

    nx = x.shape[1]
    feats_same, w_idx_same = [], []
    feats_mm, w_idx_mm = [], []
    for i in range(n - 1):
        a = outputs[layers[i]]
        if a.shape[1] == nx:
            feats_same.append(a)
            w_idx_same.append(i + 1)
        else:
            feats_mm.append(a)
            w_idx_mm.append(i + 1)

    # Hot path: x (scaled by w[0] if weighted) + every channel-matched feature.
    hot_ran = bool(feats_same) or weight
    if hot_ran:
        fused = _flat_fusion(x, feats_same, w, w_idx_same, weight)
    else:
        fused = x

    # Cold path: every channel-mismatched shortcut, fused into one pass.
    # Only alias (donate) the running buffer when it is an intermediate this
    # module owns; the caller's x is never donated.
    if feats_mm:
        fused = _prefix_fusion(fused, feats_mm, w, w_idx_mm, weight,
                               alias=hot_ran)
    return fused


# ---------------------------------------------------------------------------
# Pure-JAX reference mirroring the PyTorch forward exactly
# ---------------------------------------------------------------------------
def _reference(x, outputs, layers, weight, w_param):
    n = len(layers) + 1
    if weight:
        w = jax.nn.sigmoid(w_param.astype(jnp.float32)) * (2.0 / n)
        x = x * w[0]
    nx = x.shape[1]
    for i in range(n - 1):
        a = outputs[layers[i]]
        if weight:
            a = a * w[i + 1]
        na = a.shape[1]
        if nx == na:
            x = x + a
        elif nx > na:
            x = x.at[:, :na].add(a)
        else:
            x = x + a[:, :nx]
    return x


if __name__ == "__main__":

    def run_case(case_id, N, nx, H, W, feat_channels, weight):
        k = jax.random.fold_in(jax.random.PRNGKey(0), case_id)
        ks = jax.random.split(k, len(feat_channels) + 1)
        x = jax.random.normal(ks[0], (N, nx, H, W), dtype=jnp.float32)
        feats = [jax.random.normal(ks[1 + j], (N, c, H, W), dtype=jnp.float32)
                 for j, c in enumerate(feat_channels)]
        outputs = feats + [x]                       # outputs[-1] == current x
        layers = [-(2 + j) for j in range(len(feat_channels))]
        n = len(layers) + 1
        w_param = 0.1 * jnp.arange(n, dtype=jnp.float32)

        out = weighted_feature_fusion(x, outputs, layers, weight=weight,
                                      w_param=w_param)
        out = jax.block_until_ready(out)
        ref = _reference(x, outputs, layers, weight, w_param)
        assert out.shape == x.shape, f"case {case_id}: bad shape {out.shape}"
        assert jnp.allclose(out, ref, atol=1e-5, rtol=1e-5), \
            f"case {case_id}: mismatch vs reference"

    # 0: matched shortcut + narrower shortcut (nx > na), weighted
    #    -> hot path + aliased, prefix-only cold path.
    run_case(0, N=2, nx=16, H=16, W=16, feat_channels=(16, 8), weight=True)
    # 1: wider shortcut (nx < na), unweighted, no matched features
    #    -> cold path alone, non-aliased (caller's x is never donated).
    run_case(1, N=2, nx=16, H=16, W=16, feat_channels=(24,), weight=False)
    # 2: tiny non-8-aligned channels -> plain-JAX cold-path fallback.
    run_case(2, N=2, nx=4, H=16, W=16, feat_channels=(4, 2), weight=True)
    # 3: odd spatial size (13x13) -> non-128-divisible hot-path layout
    #    (masked lane tail, no pad/slice HBM pass).
    run_case(3, N=2, nx=16, H=13, W=13, feat_channels=(16,), weight=True)
    # 4: several mismatched shortcuts with different prefixes fused into one
    #    aliased cold-path call (where-masked smaller prefix).
    run_case(4, N=2, nx=32, H=16, W=16, feat_channels=(32, 16, 8), weight=True)
    # 5: single narrow shortcut, unweighted -> non-aliased full-channel cold
    #    path with clamped a-block index map.
    run_case(5, N=2, nx=32, H=16, W=16, feat_channels=(8,), weight=False)

    print("KERNEL_OK")
</pallas_src>

<mosaic_0001>
module attributes {stable_mosaic.version = 11 : i64} {
  func.func @_flat_fusion_kernel(%arg0: i32, %arg1: memref<3xf32, #tpu.memory_space<smem>>, %arg2: memref<8x512xf32, #tpu.memory_space<vmem>>, %arg3: memref<8x512xf32, #tpu.memory_space<vmem>>, %arg4: memref<8x512xf32, #tpu.memory_space<vmem>>) attributes {dimension_semantics = [#tpu.dimension_semantics<parallel>], iteration_bounds = array<i64: 2>, scalar_prefetch = 0 : i64, scratch_operands = 0 : i64, tpu.core_type = #tpu.core_type<tc>, window_params = [{transform_indices = @transform_0, window_bounds = array<i64: 3>}, {transform_indices = @transform_1, window_bounds = array<i64: 8, 512>}, {transform_indices = @transform_2, window_bounds = array<i64: 8, 512>}, {transform_indices = @transform_3, window_bounds = array<i64: 8, 512>}]} {
    %c0 = arith.constant 0 : index
    %c0_0 = arith.constant 0 : index
    %0 = vector.load %arg2[%c0, %c0_0] : memref<8x512xf32, #tpu.memory_space<vmem>>, vector<8x512xf32>
    %c0_1 = arith.constant 0 : index
    %1 = memref.load %arg1[%c0_1] : memref<3xf32, #tpu.memory_space<smem>>
    %2 = vector.broadcast %1 : f32 to vector<8x512xf32>
    %3 = arith.mulf %0, %2 : vector<8x512xf32>
    %c0_2 = arith.constant 0 : index
    %c0_3 = arith.constant 0 : index
    %4 = vector.load %arg3[%c0_2, %c0_3] : memref<8x512xf32, #tpu.memory_space<vmem>>, vector<8x512xf32>
    %c2 = arith.constant 2 : index
    %5 = memref.load %arg1[%c2] : memref<3xf32, #tpu.memory_space<smem>>
    %6 = vector.broadcast %5 : f32 to vector<8x512xf32>
    %7 = arith.mulf %4, %6 : vector<8x512xf32>
    %8 = arith.addf %3, %7 : vector<8x512xf32>
    %c0_4 = arith.constant 0 : index
    %c0_5 = arith.constant 0 : index
    %9 = vector.load %arg4[%c0_4, %c0_5] : memref<8x512xf32, #tpu.memory_space<vmem>>, vector<8x512xf32>
    tpu.vector_store %arg4[%c0_4, %c0_5], %8 {strides = array<i32>} : memref<8x512xf32, #tpu.memory_space<vmem>>, vector<8x512xf32>,
    return
  }
  func.func @transform_0(%arg0: i32) -> i32 {
    %c0_i32 = arith.constant 0 : i32
    %c0_i32_0 = arith.constant 0 : i32
    return %c0_i32 : i32
  }
  func.func @transform_1(%arg0: i32) -> (i32, i32) {
    %c0_i32 = arith.constant 0 : i32
    %c0_i32_0 = arith.constant 0 : i32
    return %arg0, %c0_i32 : i32, i32
  }
  func.func @transform_2(%arg0: i32) -> (i32, i32) {
    %c0_i32 = arith.constant 0 : i32
    %c0_i32_0 = arith.constant 0 : i32
    return %arg0, %c0_i32 : i32, i32
  }
  func.func @transform_3(%arg0: i32) -> (i32, i32) {
    %c0_i32 = arith.constant 0 : i32
    %c0_i32_0 = arith.constant 0 : i32
    return %arg0, %c0_i32 : i32, i32
  }
}

</mosaic_0001>

<bundles_post_ra>
// kernel: tpu_custom_call.1
= control target key start
LH: loop header
LB: loop body
LE: loop exit
PB: predicated region body
PF: predicated region fallthrough
CT: control target
= control target key end

     0   :  { %s821_s0 = inlined_call_operand.hbm [shape: f32[3], index: 0, kind: input, shape index: {}]   ;;  %s822_s1 = inlined_call_operand.hbm [shape: f32[16,512], index: 1, kind: input, shape index: {}]   ;;  %s823_s2 = inlined_call_operand.hbm [shape: f32[16,512], index: 2, kind: input, shape index: {}]   ;;  %s824_s3 = inlined_call_operand.hbm [shape: f32[16,512], index: 3, kind: output, shape index: {}]  }
   0x1   :  { %825 = sst [smem:[#allocation14_spill]] %s821_s0 }
   0x2   :  { %8 = vsyncpa [#allocation5], 0 }
   0x3   :  { %9 = vsyncpa [#allocation3], 0 }
   0x4   :  { %11 = vsyncpa [#allocation3 + $0x1], 0 }
   0x5   :  { %12 = vsyncpa [#allocation8], 0 }
   0x6   :  { %14 = vsyncpa [#allocation8 + $0x1], 0 }
   0x7   :  { %15 = vsyncpa [#allocation4], 0 }
   0x8   :  { %17 = vsyncpa [#allocation4 + $0x1], 0  ;;  %s651_s12 = smov 0   ;;  %s653_s13 = smov 0  }
   0x9   :  { %s655_s14 = smov 0   ;;  %s657_s15 = smov 0  }
   0xa LB: > { %s672_s16 = sadd.s32 4294967295, %s628_s15   ;;  %s393_s17 = sadd.s32 4294967294, %s628_s15   ;;  %s628_s15 = sphi %s657_s15, %s836_s15   ;;  %s624_s14 = sphi %s655_s14, %s835_s14   ;;  %s620_s13 = sphi %s653_s13, %s834_s13   ;;  %s616_s12 = sphi %s651_s12, %s833_s12  }
   0xb   : > { %p64_p0 = scmp.ne.s32.totalorder %s620_s13, %s616_s12  ;;  %p65_p1 = scmp.eq.s32.totalorder %s672_s16, 0 }
   0xc   : > { %p114_p2 = scmp.eq.s32.totalorder %s672_s16, 1  ;;  %p120_p3 = scmp.eq.s32.totalorder %s393_s17, 1 }
   0xd   : > { %p681_p4 = por %p65_p1, %p64_p0  ;;  %p394_p5 = scmp.ge.s32.totalorder %s628_s15, 1 }
   0xe   : > { %p686_p6 = por %p120_p3, %p64_p0  ;;  %p127_p7 = scmp.lt.s32.totalorder %s628_s15, 3 }
   0xf   : > { %s828_s0 = sld [smem:[#allocation14_spill]]  ;;  %s702_s24 = sadd.s32 1, %s628_s15  }
  0x10   : > { %p694_p8 = pnand %p394_p5, %p127_p7  ;;  %s48_s25 = ssub.s32 %s628_s15, %s702_s24 }
  0x11   : > { %p49_p12 = scmp.eq.s32.totalorder %s48_s25, 0  ;;  %s51_s26 = sadd.s32 1, %s624_s14 }
  0x12   : > { %p427_p10 = pneg %p694_p8  ;;  %p58_p13 = scmp.ne.s32.totalorder %s624_s14, %s620_s13 }
  0x13   : > { %s630_s27 = smov [#allocation2]   ;;  %p59_p0 = scmp.eq.s32.totalorder %s628_s15, 0 }
  0x14   : > { %p428_p11 = pnand %p427_p10, %p65_p1  ;;  %p717_p3 = por %p114_p2, %p58_p13 }
  0x15   : > { %s139_s22 = sshll.u32 %s828_s0, 4  ;;  %p443_p5 = scmp.lt.s32.totalorder %s628_s15, 2  ;;  %s140_s22 = int_to_ptr.hbm [resolvable:$true] %s139_s22 }
  0x16   : > { %430 = dma.hbm_to_smem (!%p428_p11), %s140_s22, 16, %s630_s27, [#allocation5]  }
  0x17   : > { %s712_s28 = scalar_select %p49_p12, %s624_s14, %s51_s26  }
  0x18   : > { %s723_s30 = sand.u32 1, %s624_s14   ;;  %p60_p7 = por %p59_p0, %p58_p13 }
  0x19   : > { %s397_s4 = sshll.u32 %s723_s30, 5  ;;  %s414_s5 = sshll.u32 %s628_s15, 5 }
  0x1a   : > { %s159_s8 = scalar_lea.hbm %s822_s1, %s414_s5  ;;  %s154_s10 = scalar_lea.vmem [#allocation6], %s397_s4 }
  0x1b   : > { %s161_s9 = sshll.u32 %s159_s8, 4  ;;  %s163_s11 = sshll.u32 %s154_s10, 4  ;;  %s162_s9 = int_to_ptr.hbm [resolvable:$true] %s161_s9  ;;  %s164_s11 = int_to_ptr.vmem [resolvable:$true] %s163_s11 }
  0x1c   : > { %p730_p2 = pnand %p443_p5, %p60_p7  ;;  %s179_s22 = scalar_lea.hbm %s823_s2, %s414_s5 }
  0x1d   : > { %s181_s25 = sshll.u32 %s179_s22, 4  ;;  %s151_s26 = scalar_lea.sflag [#allocation3], %s723_s30  ;;  %s182_s25 = int_to_ptr.hbm [resolvable:$true] %s181_s25 }
  0x1e   : > { %s494_s27 = sshra.s32 %s162_s9, 4  ;;  %p498_p11 = pneg %p730_p2  ;;  %s495_s27 = int_to_ptr.hbm [resolvable:$true] %s494_s27 }
  0x1f   : > { %s496_s6 = scalar_lea.hbm %s495_s27, 32  ;;  %s501_s10 = scalar_lea.hbm %s822_s1, 64 }
  0x20   : > { %p497_p10 = scmp.ne.s32.totalorder %s495_s27, %s496_s6  ;;  %p502_p0 = scmp.lt.s32.totalorder %s495_s27, %s822_s1 }
  0x21   : > { %p503_p5 = scmp.lt.s32.totalorder %s501_s10, %s496_s6 }
  0x22   : > { %p499_p12 = pnand %p498_p11, %p497_p10 }
  0x23   : > { %p504_p7 = por %p503_p5, %p502_p0 }
  0x24   : > { %p500_p13 = pneg %p499_p12 }
  0x26   : > { %p505_p9 = pnand %p504_p7, %p500_p13 }
  0x28   : > { %508 = shalt.err (!%p505_p9)
}
  0x29   : > { %434 = dma.hbm_to_vmem [thread:$0]  (!%p730_p2), %s162_s9, 512, %s164_s11, %s151_s26  }
  0x2a   : > { %s174_s5 = scalar_lea.vmem [#allocation7], %s397_s4  ;;  %s171_s0 = scalar_lea.sflag [#allocation8], %s723_s30 }
  0x2b   : > { %s183_s22 = sshll.u32 %s174_s5, 4  ;;  %s524_s7 = sshra.s32 %s182_s25, 4  ;;  %s184_s22 = int_to_ptr.vmem [resolvable:$true] %s183_s22  ;;  %s525_s7 = int_to_ptr.hbm [resolvable:$true] %s524_s7 }
  0x2c   : > { %s526_s8 = scalar_lea.hbm %s525_s7, 32  ;;  %s531_s10 = scalar_lea.hbm %s823_s2, 64 }
  0x2d   : > { %p527_p10 = scmp.ne.s32.totalorder %s525_s7, %s526_s8  ;;  %p532_p9 = scmp.lt.s32.totalorder %s525_s7, %s823_s2 }
  0x2e   : > { %p533_p13 = scmp.lt.s32.totalorder %s531_s10, %s526_s8 }
  0x2f   : > { %p529_p12 = pnand %p527_p10, %p498_p11 }
  0x30   : > { %p534_p5 = por %p533_p13, %p532_p9 }
  0x31   : > { %p530_p0 = pneg %p529_p12 }
  0x33   : > { %p535_p7 = pnand %p534_p5, %p530_p0 }
  0x35   : > { %538 = shalt.err (!%p535_p7)
}
  0x36   : > { %437 = dma.hbm_to_vmem [thread:$0]  (!%p730_p2), %s182_s25, 512, %s184_s22, %s171_s0  }
  0x37   : > { %192 = sbr.rel (%p694_p8) target bundleno = 87 (0x57), region = 32 }
  0x3c   : > { %599 = dma.done.wait (%p65_p1), [#allocation5], 16  }
  0x3d   : > { %601 = vsyncadd (%p65_p1), [#allocation5], 4294967280  ;;  %s770_s30 = sand.u32 1, %s620_s13  }
  0x3e   : > { %s773_s4 = sshll.u32 %s770_s30, 5  ;;  %s200_s9 = scalar_lea.sflag [#allocation3], %s770_s30 }
  0x3f   : > { %s203_s0 = scalar_lea.vmem [#allocation6], %s773_s4 }
  0x40   : > { %603 = dma.done.wait (%p681_p4), %s200_s9, 512  }
  0x41   : > { %605 = vsyncadd (%p681_p4), %s200_s9, 4294966784  ;;  %s210_s23 = scalar_lea.sflag [#allocation8], %s770_s30  ;;  %s213_s11 = scalar_lea.vmem [#allocation7], %s773_s4 }
  0x42   : > { %607 = dma.done.wait (%p681_p4), %s210_s23, 512  }
  0x43   : > { %609 = vsyncadd (%p681_p4), %s210_s23, 4294966784 }
  0x44   : > { %219 = sfence }
  0x45   : > { %s247_s17 = sld [smem:[#allocation2]]  ;;  %v243_v0 = vld [vmem:[%s203_s0] sm:$0xff]  ;;  %v244_v2 = vld [vmem:[%s203_s0 + $0x8] sm:$0xff]  ;;  %v245_v3 = vld [vmem:[%s203_s0 + $0x10] sm:$0xff]  ;;  %s416_s26 = sshll.u32 %s672_s16, 5 }
  0x46   : > { %s408_s25 = sld [smem:[#allocation2 + $0x2]]  ;;  %v253_v1 = vld [vmem:[%s213_s11] sm:$0xff]  ;;  %v254_v4 = vld [vmem:[%s213_s11 + $0x8] sm:$0xff]  ;;  %v255_v5 = vld [vmem:[%s213_s11 + $0x10] sm:$0xff]  ;;  %s283_s22 = scalar_lea.hbm %s824_s3, %s416_s26 }
  0x47   : > { %v246_v6 = vld [vmem:[%s203_s0 + $0x18] sm:$0xff]  ;;  %s242_s16 = scalar_lea.vmem [#allocation9], %s773_s4  ;;  %s287_s8 = sshll.u32 %s283_s22, 4  ;;  %s288_s8 = int_to_ptr.hbm [resolvable:$true] %s287_s8 }
  0x48   : > { %v256_v8 = vld [vmem:[%s213_s11 + $0x18] sm:$0xff]  ;;  %s285_s7 = sshll.u32 %s242_s16, 4  ;;  %s272_s27 = scalar_lea.sflag [#allocation4], %s770_s30  ;;  %s286_s7 = int_to_ptr.vmem [resolvable:$true] %s285_s7 }
  0x49   : > { %s568_s6 = sshra.s32 %s288_s8, 4  ;;  %s574_s4 = scalar_lea.hbm %s824_s3, 64  ;;  %s569_s6 = int_to_ptr.hbm [resolvable:$true] %s568_s6 }
  0x4a   : > { %s570_s10 = scalar_lea.hbm %s569_s6, 32  ;;  %p575_p2 = scmp.lt.s32.totalorder %s569_s6, %s824_s3 }
  0x4b   : > { %v248_v7 = vstv %s247_s17  ;;  %p571_p1 = scmp.ne.s32.totalorder %s569_s6, %s570_s10  ;;  %p576_p11 = scmp.lt.s32.totalorder %s574_s4, %s570_s10 }
  0x4c   : > { %v249_v9 = vmul.f32 %v248_v7, %v243_v0  ;;  %v258_v10 = vstv %s408_s25  ;;  %v250_v11 = vmul.f32 %v248_v7, %v244_v2  ;;  %v251_v12 = vmul.f32 %v248_v7, %v245_v3 }
  0x4d   : > { %v259_v13 = vmul.f32 %v258_v10, %v253_v1  ;;  %v260_v14 = vmul.f32 %v258_v10, %v254_v4  ;;  %v261_v15 = vmul.f32 %v258_v10, %v255_v5  ;;  %v252_v16 = vmul.f32 %v248_v7, %v246_v6  ;;  %p572_p4 = pnand %p571_p1, %p717_p3  ;;  %p577_p10 = por %p576_p11, %p575_p2 }
  0x4e   : > { %v262_v17 = vmul.f32 %v258_v10, %v256_v8 }
  0x4f   : > { %v263_v18 = vadd.f32 %v259_v13, %v249_v9  ;;  %v264_v19 = vadd.f32 %v260_v14, %v250_v11  ;;  %v265_v20 = vadd.f32 %v261_v15, %v251_v12  ;;  %p573_p8 = pneg %p572_p4 }
  0x50   : > { %v266_v21 = vadd.f32 %v262_v17, %v252_v16 }
  0x51   : > { %267 = vst [vmem:[%s242_s16] sm:$0xff] %v263_v18  ;;  %p578_p12 = pnand %p577_p10, %p573_p8 }
  0x52   : > { %268 = vst [vmem:[%s242_s16 + $0x8] sm:$0xff] %v264_v19 }
  0x53   : > { %269 = vst [vmem:[%s242_s16 + $0x10] sm:$0xff] %v265_v20 }
  0x54   : > { %270 = vst [vmem:[%s242_s16 + $0x18] sm:$0xff] %v266_v21 }
  0x55   : > { %581 = shalt.err (!%p578_p12)
}
  0x56   : > { %425 = dma.vmem_to_hbm [thread:$0]  (%p717_p3), %s286_s7, 512, %s288_s8, %s272_s27  }
  0x57 PF: > { %s299_s30 = sand.u32 1, %s616_s12   ;;  %p832_p0 = scmp.ge.s32.totalorder %s628_s15, 2 }
  0x58   : > { %s300_s23 = scalar_lea.sflag [#allocation4], %s299_s30 }
  0x59   : > { %p439_p9 = pnand %p832_p0, %p686_p6 }
  0x5b   : > { %p440_p13 = pneg %p439_p9 }
  0x5d   : > { %611 = dma.done.wait (%p440_p13), %s300_s23, 512  }
  0x5e   : > { %613 = vsyncadd (%p440_p13), %s300_s23, 4294966784  ;;  %p20_p5 = scmp.ge.s32.totalorder %s702_s24, 4   ;;  %s833_s12 = smov %s620_s13 }
  0x5f   : > { %s834_s13 = smov %s624_s14  ;;  %s835_s14 = smov %s712_s28 }
  0x60   : > { %s836_s15 = smov %s702_s24  ;;  %22 = sbr.rel (!%p20_p5) target bundleno = 10 (0xa), region = 95 }
  0x65   :  { %306 = vsyncpa [#allocation3], 1 }
  0x66   :  { %308 = vsyncpa [#allocation3 + $0x1], 1 }
  0x67   :  { %309 = vsyncpa [#allocation8], 1 }
  0x68   :  { %311 = vsyncpa [#allocation8 + $0x1], 1 }
  0x69   :  { %312 = vsyncpa [#allocation4], 1 }
  0x6a   :  { %314 = vsyncpa [#allocation4 + $0x1], 1 }
  0x6b   :  { %315 = vsyncpa [#allocation5], 1 }
  0x6c   :  { %317 = vsyncpa [#allocation5 + $0x1], 1 }

</bundles_post_ra>
